<compile_context>
chip_gen: v6e
topology: v6e:2x2x1
jax: 0.10.0
libtpu: 0.0.40
codegen_flags: <defaults>
</compile_context>

<pallas_src>
import jax
import jax.numpy as jnp
from jax.experimental import pallas as pl
from jax.experimental.pallas import tpu as pltpu


def _round_up(x: int, m: int) -> int:
    return ((x + m - 1) // m) * m


def _pick_tile(padded_dim: int, align: int, max_tile: int) -> int:
    """Largest multiple of `align` that divides `padded_dim` and is <= max_tile."""
    best = align
    t = align
    limit = min(max_tile, padded_dim)
    while t <= limit:
        if padded_dim % t == 0:
            best = t
        t += align
    return best


def _physical_vmem_bytes() -> int:
    try:
        return int(pltpu.get_tpu_info().vmem_capacity_bytes)
    except Exception:
        return 64 << 20  # conservative default: v7x per-TensorCore VMEM


def _pad_cast(x, shape, dtype):
    """Zero-pad to `shape` and cast to `dtype`; no-op when already matching."""
    if x.dtype != dtype:
        x = x.astype(dtype)
    if tuple(x.shape) != tuple(shape):
        pads = [(0, t - s) for s, t in zip(x.shape, shape)]
        x = jnp.pad(x, pads)
    return x


def gcn_kernel(adj_ref, feat_ref, w_ref, bias_ref, out_ref, support_ref, acc_ref):
    # adj_ref:     (TM, TK)           bf16  -- one adjacency tile of this batch
    # feat_ref:    (Ncols_p, Finp)    bf16  -- full per-batch features (Buffered(1))
    # w_ref:       (Finp, Foutp)      bf16  -- shared weight           (Buffered(1))
    # bias_ref:    (1, Foutp)         f32                              (Buffered(1))
    # out_ref:     (TM, Foutp)        f32   -- output row tile (resident across k)
    # support_ref: (Ncols_p, Foutp)   bf16  -- per-batch support, resident scratch
    # acc_ref:     (TM, Foutp)        f32   -- row-tile accumulator across k
    r = pl.program_id(1)
    k = pl.program_id(2)
    nk = pl.num_programs(2)
    tk = adj_ref.shape[1]
    col0 = pl.multiple_of(k * tk, tk)

    # Build support = features @ W incrementally: during the first row pass
    # each k step produces exactly the TK-row chunk this step (and every later
    # row tile) consumes.  Bounded f32 temporary: (TK, Foutp).
    @pl.when(r == 0)
    def _():
        chunk = jnp.dot(feat_ref[pl.ds(col0, tk), :], w_ref[...],
                        preferred_element_type=jnp.float32)
        support_ref[pl.ds(col0, tk), :] = chunk.astype(support_ref.dtype)

    @pl.when(k == 0)
    def _():
        acc_ref[...] = jnp.zeros_like(acc_ref)

    # Partial product for this adjacency column tile, accumulated in f32.
    acc_ref[...] += jnp.dot(adj_ref[...], support_ref[pl.ds(col0, tk), :],
                            preferred_element_type=jnp.float32)

    @pl.when(k == nk - 1)
    def _():
        out_ref[...] = (acc_ref[...] + bias_ref[...]).astype(out_ref.dtype)


def graph_convolution(adjacency, features, weight, bias=None, *,
                      row_tile=None, col_tile=None,
                      compute_dtype=jnp.bfloat16, out_dtype=jnp.float32):
    """adjacency: [B, N, N], features: [B, N, Fin], weight: [Fin, Fout],
    bias: [Fout] or None.  Returns [B, N, Fout] in `out_dtype`."""
    B, N, Fin = features.shape
    Fout = weight.shape[1]
    assert adjacency.shape == (B, N, N)

    isz = jnp.dtype(compute_dtype).itemsize
    osz = jnp.dtype(out_dtype).itemsize
    phys_vmem = _physical_vmem_bytes()
    big_vmem = phys_vmem >= (96 << 20)     # v5e/v6e (128 MiB) vs v7x (64 MiB)

    # Lane-dense padding of the feature dims.
    fin_p = _round_up(Fin, 128)
    fout_p = _round_up(Fout, 128)

    # Decoupled row/column padding of the node dim: rows only need the sublane
    # multiple (8) / TM, columns (== support rows) the lane multiple (128) / TK.
    if row_tile is None:
        n_rows_p = _round_up(N, 8)
        tm = _pick_tile(n_rows_p, 8, 512 if big_vmem else 256)
    else:
        tm = _round_up(row_tile, 8)
        n_rows_p = _round_up(N, tm)
    if col_tile is None:
        n_cols_p = _round_up(N, 128)
        tk = _pick_tile(n_cols_p, 128, 512)
    else:
        tk = _round_up(col_tile, 128)
        n_cols_p = _round_up(N, tk)
    n_row_tiles = n_rows_p // tm
    n_col_tiles = n_cols_p // tk

    # Deeper adjacency buffering on 128-MiB parts hides the r==0 support bubble.
    adj_bufs = 3 if big_vmem else 2

    # Pad/cast only when needed (zero padding contributes nothing to the real
    # outputs).  Aligned bf16 inputs pass straight through (no HBM re-stream).
    adj_p = _pad_cast(adjacency, (B, n_rows_p, n_cols_p), compute_dtype)
    feat_p = _pad_cast(features, (B, n_cols_p, fin_p), compute_dtype)
    w_p = _pad_cast(weight, (fin_p, fout_p), compute_dtype)
    if bias is None:
        bias_p = jnp.zeros((1, fout_p), jnp.float32)
    else:
        bias_p = _pad_cast(bias.reshape(1, Fout), (1, fout_p), jnp.float32)

    # VMEM footprint (per core): pipelined buffers + resident support scratch
    # + f32 accumulator + bounded f32 matmul temporaries.
    needed = (adj_bufs * tm * tk * isz                 # adjacency tiles
              + 1 * n_cols_p * fin_p * isz             # features (single buffer)
              + 1 * fin_p * fout_p * isz               # weight   (single buffer)
              + 1 * 8 * fout_p * 4                     # bias     (single buffer)
              + 2 * tm * fout_p * osz                  # output row tiles
              + n_cols_p * fout_p * isz                # support scratch
              + tm * fout_p * 4                        # f32 accumulator
              + (tk + tm) * fout_p * 4)                # f32 dot temporaries
    headroom = 12 << 20
    usable = phys_vmem - headroom
    if needed + (2 << 20) > usable:
        raise ValueError(
            f"GCN kernel VMEM footprint ({needed / 2**20:.1f} MiB) does not fit in "
            f"{usable / 2**20:.1f} MiB of usable VMEM; reduce row_tile/col_tile or "
            f"shard the node dimension.")
    vmem_limit = int(min(max(needed + (4 << 20), 32 << 20), usable))

    cost = pl.CostEstimate(
        flops=2 * B * (n_cols_p * fin_p * fout_p + n_rows_p * n_cols_p * fout_p),
        transcendentals=0,
        bytes_accessed=(int(adj_p.size) + int(feat_p.size) + int(w_p.size)) * isz
        + int(bias_p.size) * 4 + B * n_rows_p * fout_p * osz,
    )

    def build(use_buffer_hints):
        def spec(shape, imap, bufs=None):
            if use_buffer_hints and bufs is not None:
                return pl.BlockSpec(shape, imap, pipeline_mode=pl.Buffered(bufs))
            return pl.BlockSpec(shape, imap)

        return pl.pallas_call(
            gcn_kernel,
            out_shape=jax.ShapeDtypeStruct((B, n_rows_p, fout_p), out_dtype),
            grid_spec=pltpu.PrefetchScalarGridSpec(
                num_scalar_prefetch=0,
                grid=(B, n_row_tiles, n_col_tiles),
                in_specs=[
                    # adjacency: one (TM, TK) tile per step
                    spec((pl.Squeezed(), tm, tk),
                         lambda b, r, k: (b, r, k), adj_bufs),
                    # features: full per-batch block (re-fetched only when b
                    # changes); single-buffered since it is block-constant
                    spec((pl.Squeezed(), n_cols_p, fin_p),
                         lambda b, r, k: (b, 0, 0), 1),
                    # weight / bias: grid-constant, single-buffered
                    spec((fin_p, fout_p), lambda b, r, k: (0, 0), 1),
                    spec((1, fout_p), lambda b, r, k: (0, 0), 1),
                ],
                out_specs=spec((pl.Squeezed(), tm, fout_p),
                               lambda b, r, k: (b, r, 0)),
                scratch_shapes=[pltpu.VMEM((n_cols_p, fout_p), compute_dtype),
                                pltpu.VMEM((tm, fout_p), jnp.float32)],
            ),
            compiler_params=pltpu.CompilerParams(
                # Batch axis shards across TensorCores; the row axis must stay
                # sequential (support scratch is written at r == 0 and reused);
                # the k axis accumulates into the resident output tile.
                dimension_semantics=("parallel", "arbitrary", "arbitrary"),
                vmem_limit_bytes=vmem_limit,
            ),
            cost_estimate=cost,
        )

    try:
        out = jax.block_until_ready(build(True)(adj_p, feat_p, w_p, bias_p))
    except Exception:
        # Fallback: identical kernel/specs without pipeline_mode buffer hints.
        out = build(False)(adj_p, feat_p, w_p, bias_p)

    # Slice away the padding.
    return out[:, :N, :Fout]


if __name__ == "__main__":
    # Small shapes consistent with the module's forward:
    #   batch B=2, nodes N=8, in_features=16, out_features=32
    B, N, Fin, Fout = 2, 8, 16, 32
    key = jax.random.PRNGKey(0)
    k_adj, k_feat, k_w, k_b = jax.random.split(key, 4)

    adjacency = jax.random.uniform(k_adj, (B, N, N), dtype=jnp.float32)
    features = jax.random.normal(k_feat, (B, N, Fin), dtype=jnp.float32)

    # Deterministic 'thomas'-style init: uniform(-1/sqrt(fan_out), 1/sqrt(fan_out))
    stdv = 1.0 / jnp.sqrt(jnp.float32(Fout))
    weight = jax.random.uniform(k_w, (Fin, Fout), dtype=jnp.float32,
                                minval=-stdv, maxval=stdv)
    bias = jax.random.uniform(k_b, (Fout,), dtype=jnp.float32,
                              minval=-stdv, maxval=stdv)

    out = jax.block_until_ready(graph_convolution(adjacency, features, weight, bias))
    assert out.shape == (B, N, Fout)

    # Reference mirroring the kernel's bf16-input / f32-accumulate precision.
    def bf(x):
        return x.astype(jnp.bfloat16).astype(jnp.float32)

    support_ref = bf(jnp.einsum("bnf,fo->bno", bf(features), bf(weight)))
    ref = jnp.einsum("bnm,bmo->bno", bf(adjacency), support_ref) + bias
    assert jnp.allclose(out, ref, atol=2e-2, rtol=2e-2), "mismatch vs bf16 reference"

    # Loose check against full-f32 math (bf16 MXU inputs vs f64 PyTorch).
    ref32 = jnp.einsum("bnm,bmo->bno", adjacency,
                       jnp.einsum("bnf,fo->bno", features, weight)) + bias
    assert jnp.allclose(out, ref32, atol=1e-1, rtol=1e-1), "mismatch vs f32 reference"

    # Second check: exercise the multi-tile grid (several row tiles, K-axis
    # accumulation, incremental support fill, row/column padding slice-off).
    B2, N2, Fin2, Fout2 = 2, 200, 48, 96
    k_adj2, k_feat2, k_w2, k_b2 = jax.random.split(jax.random.PRNGKey(1), 4)
    adj2 = jax.random.uniform(k_adj2, (B2, N2, N2), dtype=jnp.float32)
    feat2 = jax.random.normal(k_feat2, (B2, N2, Fin2), dtype=jnp.float32)
    stdv2 = 1.0 / jnp.sqrt(jnp.float32(Fout2))
    w2 = jax.random.uniform(k_w2, (Fin2, Fout2), dtype=jnp.float32,
                            minval=-stdv2, maxval=stdv2)
    b2 = jax.random.uniform(k_b2, (Fout2,), dtype=jnp.float32,
                            minval=-stdv2, maxval=stdv2)

    out2 = jax.block_until_ready(
        graph_convolution(adj2, feat2, w2, b2, row_tile=64, col_tile=128))
    assert out2.shape == (B2, N2, Fout2)
    support2 = bf(jnp.einsum("bnf,fo->bno", bf(feat2), bf(w2)))
    ref2 = jnp.einsum("bnm,bmo->bno", bf(adj2), support2) + b2
    assert jnp.allclose(out2, ref2, atol=3e-2, rtol=3e-2), \
        "mismatch vs bf16 reference (tiled)"

    print("KERNEL_OK")
</pallas_src>

<mosaic_0001>
module attributes {stable_mosaic.version = 11 : i64} {
  func.func @gcn_kernel(%arg0: i32, %arg1: i32, %arg2: i32, %arg3: memref<1x8x128xbf16, #tpu.memory_space<vmem>>, %arg4: memref<1x128x128xbf16, #tpu.memory_space<vmem>>, %arg5: memref<128x128xbf16, #tpu.memory_space<vmem>>, %arg6: memref<1x128xf32, #tpu.memory_space<vmem>>, %arg7: memref<1x8x128xf32, #tpu.memory_space<vmem>>, %arg8: memref<128x128xbf16, #tpu.memory_space<vmem>>, %arg9: memref<8x128xf32, #tpu.memory_space<vmem>>) attributes {dimension_semantics = [#tpu.dimension_semantics<parallel>, #tpu.dimension_semantics<arbitrary>, #tpu.dimension_semantics<arbitrary>], iteration_bounds = array<i64: 2, 1, 1>, scalar_prefetch = 0 : i64, scratch_operands = 2 : i64, tpu.core_type = #tpu.core_type<tc>, window_params = [{pipeline_mode = #tpu.pipeline_mode<double_buffered>, transform_indices = @transform_0, window_bounds = array<i64: 1, 8, 128>}, {pipeline_mode = #tpu.pipeline_mode<synchronous>, transform_indices = @transform_1, window_bounds = array<i64: 1, 128, 128>}, {pipeline_mode = #tpu.pipeline_mode<synchronous>, transform_indices = @transform_2, window_bounds = array<i64: 128, 128>}, {pipeline_mode = #tpu.pipeline_mode<synchronous>, transform_indices = @transform_3, window_bounds = array<i64: 1, 128>}, {transform_indices = @transform_4, window_bounds = array<i64: 1, 8, 128>}]} {
    %c128_i32 = arith.constant 128 : i32
    %0 = arith.muli %arg2, %c128_i32 : i32
    %1 = tpu.assume_multiple %0, 128 : i32
    %c0_i32 = arith.constant 0 : i32
    %2 = arith.cmpi eq, %arg1, %c0_i32 : i32
    %3 = arith.extui %2 : i1 to i32
    %c0_i32_0 = arith.constant 0 : i32
    %4 = arith.cmpi ne, %3, %c0_i32_0 : i32
    scf.if %4 {
      %c0_12 = arith.constant 0 : index
      %19 = arith.index_cast %1 : i32 to index
      %c0_13 = arith.constant 0 : index
      %20 = vector.load %arg4[%c0_12, %19, %c0_13] : memref<1x128x128xbf16, #tpu.memory_space<vmem>>, vector<1x128x128xbf16>
      %21 = vector.shape_cast %20 : vector<1x128x128xbf16> to vector<128x128xbf16>
      %c0_14 = arith.constant 0 : index
      %c0_15 = arith.constant 0 : index
      %22 = vector.load %arg5[%c0_14, %c0_15] : memref<128x128xbf16, #tpu.memory_space<vmem>>, vector<128x128xbf16>
      %cst_16 = arith.constant dense<0.000000e+00> : vector<128x128xf32>
      %23 = tpu.matmul %21, %22, %cst_16 {dimension_numbers = #tpu.dot_dimension_numbers<[1], [0], [0], [1], [0, 0, 1, 1], [], []>} : vector<128x128xbf16>, vector<128x128xbf16>, vector<128x128xf32> -> vector<128x128xf32>
      %24 = arith.truncf %23 : vector<128x128xf32> to vector<128x128xbf16>
      %25 = arith.index_cast %1 : i32 to index
      %c0_17 = arith.constant 0 : index
      %26 = vector.load %arg8[%25, %c0_17] : memref<128x128xbf16, #tpu.memory_space<vmem>>, vector<128x128xbf16>
      tpu.vector_store %arg8[%25, %c0_17], %24 {strides = array<i32>} : memref<128x128xbf16, #tpu.memory_space<vmem>>, vector<128x128xbf16>,
    } else {
    }
    %c0_i32_1 = arith.constant 0 : i32
    %5 = arith.cmpi eq, %arg2, %c0_i32_1 : i32
    %6 = arith.extui %5 : i1 to i32
    %c0_i32_2 = arith.constant 0 : i32
    %7 = arith.cmpi ne, %6, %c0_i32_2 : i32
    scf.if %7 {
      %cst_12 = arith.constant 0.000000e+00 : f32
      %19 = vector.broadcast %cst_12 : f32 to vector<8x128xf32>
      %c0_13 = arith.constant 0 : index
      %c0_14 = arith.constant 0 : index
      %20 = vector.load %arg9[%c0_13, %c0_14] : memref<8x128xf32, #tpu.memory_space<vmem>>, vector<8x128xf32>
      tpu.vector_store %arg9[%c0_13, %c0_14], %19 {strides = array<i32>} : memref<8x128xf32, #tpu.memory_space<vmem>>, vector<8x128xf32>,
    } else {
    }
    %c0 = arith.constant 0 : index
    %c0_3 = arith.constant 0 : index
    %8 = vector.load %arg9[%c0, %c0_3] : memref<8x128xf32, #tpu.memory_space<vmem>>, vector<8x128xf32>
    %c0_4 = arith.constant 0 : index
    %c0_5 = arith.constant 0 : index
    %c0_6 = arith.constant 0 : index
    %9 = vector.load %arg3[%c0_4, %c0_5, %c0_6] : memref<1x8x128xbf16, #tpu.memory_space<vmem>>, vector<1x8x128xbf16>
    %10 = vector.shape_cast %9 : vector<1x8x128xbf16> to vector<8x128xbf16>
    %11 = arith.index_cast %1 : i32 to index
    %c0_7 = arith.constant 0 : index
    %12 = vector.load %arg8[%11, %c0_7] : memref<128x128xbf16, #tpu.memory_space<vmem>>, vector<128x128xbf16>
    %cst = arith.constant dense<0.000000e+00> : vector<8x128xf32>
    %13 = tpu.matmul %10, %12, %cst {dimension_numbers = #tpu.dot_dimension_numbers<[1], [0], [0], [1], [0, 0, 1, 1], [], []>} : vector<8x128xbf16>, vector<128x128xbf16>, vector<8x128xf32> -> vector<8x128xf32>
    %14 = arith.addf %8, %13 : vector<8x128xf32>
    %c0_8 = arith.constant 0 : index
    %c0_9 = arith.constant 0 : index
    %15 = vector.load %arg9[%c0_8, %c0_9] : memref<8x128xf32, #tpu.memory_space<vmem>>, vector<8x128xf32>
    tpu.vector_store %arg9[%c0_8, %c0_9], %14 {strides = array<i32>} : memref<8x128xf32, #tpu.memory_space<vmem>>, vector<8x128xf32>,
    %c0_i32_10 = arith.constant 0 : i32
    %16 = arith.cmpi eq, %arg2, %c0_i32_10 : i32
    %17 = arith.extui %16 : i1 to i32
    %c0_i32_11 = arith.constant 0 : i32
    %18 = arith.cmpi ne, %17, %c0_i32_11 : i32
    scf.if %18 {
      %c0_12 = arith.constant 0 : index
      %c0_13 = arith.constant 0 : index
      %19 = vector.load %arg9[%c0_12, %c0_13] : memref<8x128xf32, #tpu.memory_space<vmem>>, vector<8x128xf32>
      %c0_14 = arith.constant 0 : index
      %c0_15 = arith.constant 0 : index
      %20 = vector.load %arg6[%c0_14, %c0_15] : memref<1x128xf32, #tpu.memory_space<vmem>>, vector<1x128xf32>
      %21 = vector.broadcast %20 : vector<1x128xf32> to vector<8x128xf32>
      %22 = arith.addf %19, %21 : vector<8x128xf32>
      %c0_16 = arith.constant 0 : index
      %c0_17 = arith.constant 0 : index
      %c0_18 = arith.constant 0 : index
      %23 = vector.load %arg7[%c0_16, %c0_17, %c0_18] : memref<1x8x128xf32, #tpu.memory_space<vmem>>, vector<1x8x128xf32>
      %24 = vector.shape_cast %23 : vector<1x8x128xf32> to vector<8x128xf32>
      %25 = vector.shape_cast %22 : vector<8x128xf32> to vector<1x8x128xf32>
      tpu.vector_store %arg7[%c0_16, %c0_17, %c0_18], %25 {strides = array<i32>} : memref<1x8x128xf32, #tpu.memory_space<vmem>>, vector<1x8x128xf32>,
    } else {
    }
    return
  }
  func.func @transform_0(%arg0: i32, %arg1: i32, %arg2: i32) -> (i32, i32, i32) {
    %c0_i32 = arith.constant 0 : i32
    return %arg0, %arg1, %arg2 : i32, i32, i32
  }
  func.func @transform_1(%arg0: i32, %arg1: i32, %arg2: i32) -> (i32, i32, i32) {
    %c0_i32 = arith.constant 0 : i32
    %c0_i32_0 = arith.constant 0 : i32
    %c0_i32_1 = arith.constant 0 : i32
    return %arg0, %c0_i32, %c0_i32_0 : i32, i32, i32
  }
  func.func @transform_2(%arg0: i32, %arg1: i32, %arg2: i32) -> (i32, i32) {
    %c0_i32 = arith.constant 0 : i32
    %c0_i32_0 = arith.constant 0 : i32
    %c0_i32_1 = arith.constant 0 : i32
    return %c0_i32, %c0_i32_0 : i32, i32
  }
  func.func @transform_3(%arg0: i32, %arg1: i32, %arg2: i32) -> (i32, i32) {
    %c0_i32 = arith.constant 0 : i32
    %c0_i32_0 = arith.constant 0 : i32
    %c0_i32_1 = arith.constant 0 : i32
    return %c0_i32, %c0_i32_0 : i32, i32
  }
  func.func @transform_4(%arg0: i32, %arg1: i32, %arg2: i32) -> (i32, i32, i32) {
    %c0_i32 = arith.constant 0 : i32
    %c0_i32_0 = arith.constant 0 : i32
    return %arg0, %arg1, %c0_i32 : i32, i32, i32
  }
}

module attributes {stable_mosaic.version = 11 : i64} {
  func.func @gcn_kernel(%arg0: i32, %arg1: i32, %arg2: i32, %arg3: memref<1x8x128xbf16, #tpu.memory_space<vmem>>, %arg4: memref<1x128x128xbf16, #tpu.memory_space<vmem>>, %arg5: memref<128x128xbf16, #tpu.memory_space<vmem>>, %arg6: memref<1x128xf32, #tpu.memory_space<vmem>>, %arg7: memref<1x8x128xf32, #tpu.memory_space<vmem>>, %arg8: memref<128x128xbf16, #tpu.memory_space<vmem>>, %arg9: memref<8x128xf32, #tpu.memory_space<vmem>>) attributes {dimension_semantics = [#tpu.dimension_semantics<parallel>, #tpu.dimension_semantics<arbitrary>, #tpu.dimension_semantics<arbitrary>], iteration_bounds = array<i64: 2, 1, 1>, scalar_prefetch = 0 : i64, scratch_operands = 2 : i64, tpu.core_type = #tpu.core_type<tc>, window_params = [{transform_indices = @transform_0, window_bounds = array<i64: 1, 8, 128>}, {transform_indices = @transform_1, window_bounds = array<i64: 1, 128, 128>}, {pipeline_mode = #tpu.pipeline_mode<synchronous>, transform_indices = @transform_2, window_bounds = array<i64: 128, 128>}, {pipeline_mode = #tpu.pipeline_mode<synchronous>, transform_indices = @transform_3, window_bounds = array<i64: 1, 128>}, {transform_indices = @transform_4, window_bounds = array<i64: 1, 8, 128>}]} {
    %c128_i32 = arith.constant 128 : i32
    %0 = arith.muli %arg2, %c128_i32 : i32
    %1 = tpu.assume_multiple %0, 128 : i32
    %c0_i32 = arith.constant 0 : i32
    %2 = arith.cmpi eq, %arg1, %c0_i32 : i32
    %3 = arith.extui %2 : i1 to i32
    %c0_i32_0 = arith.constant 0 : i32
    %4 = arith.cmpi ne, %3, %c0_i32_0 : i32
    scf.if %4 {
      %c0_12 = arith.constant 0 : index
      %19 = arith.index_cast %1 : i32 to index
      %c0_13 = arith.constant 0 : index
      %20 = vector.load %arg4[%c0_12, %19, %c0_13] : memref<1x128x128xbf16, #tpu.memory_space<vmem>>, vector<1x128x128xbf16>
      %21 = vector.shape_cast %20 : vector<1x128x128xbf16> to vector<128x128xbf16>
      %c0_14 = arith.constant 0 : index
      %c0_15 = arith.constant 0 : index
      %22 = vector.load %arg5[%c0_14, %c0_15] : memref<128x128xbf16, #tpu.memory_space<vmem>>, vector<128x128xbf16>
      %cst_16 = arith.constant dense<0.000000e+00> : vector<128x128xf32>
      %23 = tpu.matmul %21, %22, %cst_16 {dimension_numbers = #tpu.dot_dimension_numbers<[1], [0], [0], [1], [0, 0, 1, 1], [], []>} : vector<128x128xbf16>, vector<128x128xbf16>, vector<128x128xf32> -> vector<128x128xf32>
      %24 = arith.truncf %23 : vector<128x128xf32> to vector<128x128xbf16>
      %25 = arith.index_cast %1 : i32 to index
      %c0_17 = arith.constant 0 : index
      %26 = vector.load %arg8[%25, %c0_17] : memref<128x128xbf16, #tpu.memory_space<vmem>>, vector<128x128xbf16>
      tpu.vector_store %arg8[%25, %c0_17], %24 {strides = array<i32>} : memref<128x128xbf16, #tpu.memory_space<vmem>>, vector<128x128xbf16>,
    } else {
    }
    %c0_i32_1 = arith.constant 0 : i32
    %5 = arith.cmpi eq, %arg2, %c0_i32_1 : i32
    %6 = arith.extui %5 : i1 to i32
    %c0_i32_2 = arith.constant 0 : i32
    %7 = arith.cmpi ne, %6, %c0_i32_2 : i32
    scf.if %7 {
      %cst_12 = arith.constant 0.000000e+00 : f32
      %19 = vector.broadcast %cst_12 : f32 to vector<8x128xf32>
      %c0_13 = arith.constant 0 : index
      %c0_14 = arith.constant 0 : index
      %20 = vector.load %arg9[%c0_13, %c0_14] : memref<8x128xf32, #tpu.memory_space<vmem>>, vector<8x128xf32>
      tpu.vector_store %arg9[%c0_13, %c0_14], %19 {strides = array<i32>} : memref<8x128xf32, #tpu.memory_space<vmem>>, vector<8x128xf32>,
    } else {
    }
    %c0 = arith.constant 0 : index
    %c0_3 = arith.constant 0 : index
    %8 = vector.load %arg9[%c0, %c0_3] : memref<8x128xf32, #tpu.memory_space<vmem>>, vector<8x128xf32>
    %c0_4 = arith.constant 0 : index
    %c0_5 = arith.constant 0 : index
    %c0_6 = arith.constant 0 : index
    %9 = vector.load %arg3[%c0_4, %c0_5, %c0_6] : memref<1x8x128xbf16, #tpu.memory_space<vmem>>, vector<1x8x128xbf16>
    %10 = vector.shape_cast %9 : vector<1x8x128xbf16> to vector<8x128xbf16>
    %11 = arith.index_cast %1 : i32 to index
    %c0_7 = arith.constant 0 : index
    %12 = vector.load %arg8[%11, %c0_7] : memref<128x128xbf16, #tpu.memory_space<vmem>>, vector<128x128xbf16>
    %cst = arith.constant dense<0.000000e+00> : vector<8x128xf32>
    %13 = tpu.matmul %10, %12, %cst {dimension_numbers = #tpu.dot_dimension_numbers<[1], [0], [0], [1], [0, 0, 1, 1], [], []>} : vector<8x128xbf16>, vector<128x128xbf16>, vector<8x128xf32> -> vector<8x128xf32>
    %14 = arith.addf %8, %13 : vector<8x128xf32>
    %c0_8 = arith.constant 0 : index
    %c0_9 = arith.constant 0 : index
    %15 = vector.load %arg9[%c0_8, %c0_9] : memref<8x128xf32, #tpu.memory_space<vmem>>, vector<8x128xf32>
    tpu.vector_store %arg9[%c0_8, %c0_9], %14 {strides = array<i32>} : memref<8x128xf32, #tpu.memory_space<vmem>>, vector<8x128xf32>,
    %c0_i32_10 = arith.constant 0 : i32
    %16 = arith.cmpi eq, %arg2, %c0_i32_10 : i32
    %17 = arith.extui %16 : i1 to i32
    %c0_i32_11 = arith.constant 0 : i32
    %18 = arith.cmpi ne, %17, %c0_i32_11 : i32
    scf.if %18 {
      %c0_12 = arith.constant 0 : index
      %c0_13 = arith.constant 0 : index
      %19 = vector.load %arg9[%c0_12, %c0_13] : memref<8x128xf32, #tpu.memory_space<vmem>>, vector<8x128xf32>
      %c0_14 = arith.constant 0 : index
      %c0_15 = arith.constant 0 : index
      %20 = vector.load %arg6[%c0_14, %c0_15] : memref<1x128xf32, #tpu.memory_space<vmem>>, vector<1x128xf32>
      %21 = vector.broadcast %20 : vector<1x128xf32> to vector<8x128xf32>
      %22 = arith.addf %19, %21 : vector<8x128xf32>
      %c0_16 = arith.constant 0 : index
      %c0_17 = arith.constant 0 : index
      %c0_18 = arith.constant 0 : index
      %23 = vector.load %arg7[%c0_16, %c0_17, %c0_18] : memref<1x8x128xf32, #tpu.memory_space<vmem>>, vector<1x8x128xf32>
      %24 = vector.shape_cast %23 : vector<1x8x128xf32> to vector<8x128xf32>
      %25 = vector.shape_cast %22 : vector<8x128xf32> to vector<1x8x128xf32>
      tpu.vector_store %arg7[%c0_16, %c0_17, %c0_18], %25 {strides = array<i32>} : memref<1x8x128xf32, #tpu.memory_space<vmem>>, vector<1x8x128xf32>,
    } else {
    }
    return
  }
  func.func @transform_0(%arg0: i32, %arg1: i32, %arg2: i32) -> (i32, i32, i32) {
    %c0_i32 = arith.constant 0 : i32
    return %arg0, %arg1, %arg2 : i32, i32, i32
  }
  func.func @transform_1(%arg0: i32, %arg1: i32, %arg2: i32) -> (i32, i32, i32) {
    %c0_i32 = arith.constant 0 : i32
    %c0_i32_0 = arith.constant 0 : i32
    %c0_i32_1 = arith.constant 0 : i32
    return %arg0, %c0_i32, %c0_i32_0 : i32, i32, i32
  }
  func.func @transform_2(%arg0: i32, %arg1: i32, %arg2: i32) -> (i32, i32) {
    %c0_i32 = arith.constant 0 : i32
    %c0_i32_0 = arith.constant 0 : i32
    %c0_i32_1 = arith.constant 0 : i32
    return %c0_i32, %c0_i32_0 : i32, i32
  }
  func.func @transform_3(%arg0: i32, %arg1: i32, %arg2: i32) -> (i32, i32) {
    %c0_i32 = arith.constant 0 : i32
    %c0_i32_0 = arith.constant 0 : i32
    %c0_i32_1 = arith.constant 0 : i32
    return %c0_i32, %c0_i32_0 : i32, i32
  }
  func.func @transform_4(%arg0: i32, %arg1: i32, %arg2: i32) -> (i32, i32, i32) {
    %c0_i32 = arith.constant 0 : i32
    %c0_i32_0 = arith.constant 0 : i32
    return %arg0, %arg1, %c0_i32 : i32, i32, i32
  }
}

</mosaic_0001>

<bundles_post_ra>
// kernel: tpu_custom_call.1
= control target key start
LH: loop header
LB: loop body
LE: loop exit
PB: predicated region body
PF: predicated region fallthrough
CT: control target
= control target key end

     0   :  { %s1580_s0 = inlined_call_operand.hbm [shape: bf16[2,8,128], index: 0, kind: input, shape index: {}]   ;;  %s1581_s1 = inlined_call_operand.hbm [shape: bf16[2,128,128], index: 1, kind: input, shape index: {}]   ;;  %s1582_s2 = inlined_call_operand.hbm [shape: bf16[128,128], index: 2, kind: input, shape index: {}]   ;;  %s1583_s3 = inlined_call_operand.vmem [shape: f32[1,128], index: 3, kind: input, shape index: {}]   ;;  %s1584_s4 = inlined_call_operand.hbm [shape: f32[2,8,128], index: 4, kind: output, shape index: {}]  }
   0x1   :  { %1592 = sst [smem:[#allocation15_spill]] %s1581_s1 }
   0x2   :  { %9 = vsyncpa [#allocation5], 0 }
   0x3   :  { %11 = vsyncpa [#allocation5 + $0x1], 0 }
   0x4   :  { %12 = vsyncpa [#allocation8], 0 }
   0x5   :  { %13 = vsyncpa [#allocation6], 0 }
   0x6   :  { %15 = vsyncpa [#allocation6 + $0x1], 0  ;;  %s1361_s15 = smov 0   ;;  %s1363_s16 = smov 0  }
   0x7   :  { %s1365_s17 = smov 0   ;;  %s1367_s18 = smov 0  }
   0x8   :  { %s1369_s19 = smov 0   ;;  %s1371_s20 = smov 0  }
   0x9 LB: > { %s850_s21 = sadd.s32 4294967295, %s1326_s20   ;;  %s851_s22 = sadd.s32 4294967294, %s1326_s20   ;;  %s1326_s20 = sphi %s1371_s20, %s21_s20   ;;  %s1322_s19 = sphi %s1369_s19, %s1613_s19   ;;  %s1318_s18 = sphi %s1367_s18, %s1612_s18   ;;  %s1314_s17 = sphi %s1365_s17, %s1611_s17   ;;  %s1310_s16 = sphi %s1363_s16, %s1610_s16   ;;  %s1306_s15 = sphi %s1361_s15, %s1609_s15  }
   0xa   : > { %p64_p0 = scmp.ne.s32.totalorder %s1310_s16, %s1306_s15  ;;  %p1397_p1 = scmp.eq.s32.totalorder %s850_s21, 0 }
   0xb   : > { %p164_p2 = scmp.eq.s32.totalorder %s851_s22, 1  ;;  %p852_p3 = scmp.ge.s32.totalorder %s1326_s20, 1 }
   0xc   : > { %s1593_s23 = scalar_select %p1397_p1, 1, 0 }
   0xd   : > { %p1404_p4 = por %p1397_p1, %p64_p0  ;;  %p171_p5 = scmp.lt.s32.totalorder %s1326_s20, 3 }
   0xe   : > { %p1409_p6 = por %p164_p2, %p64_p0  ;;  %s908_s26 = sshll.u32 %s1318_s18, 10 }
   0xf   : > { %s1594_s24 = scalar_select %p1404_p4, 1, 0 }
  0x10   : > { %s1595_s25 = scalar_select %p1409_p6, 1, 0 }
  0x11   : > { %p1414_p7 = pnand %p852_p3, %p171_p5  ;;  %s1597_s1 = sld [smem:[#allocation15_spill]] }
  0x12   : > { %s1328_s5 = smov [#allocation7]   ;;  %s1329_s8 = smov [#allocation9]  }
  0x13   : > { %s1596_s27 = scalar_select %p1414_p7, 1, 0 }
  0x14   : > { %p1585_p8 = pneg %p1414_p7  ;;  %s186_s6 = sshll.u32 %s1328_s5, 4  ;;  %s1425_s6 = int_to_ptr.vmem [resolvable:$true] %s186_s6 }
  0x15   : > { %s199_s9 = sshll.u32 %s1329_s8, 4  ;;  %s200_s9 = int_to_ptr.vmem [resolvable:$true] %s199_s9 }
  0x16   : > { %p1432_p9 = pnand %p1585_p8, %p1404_p4 }
  0x17   : > { %s1421_s30 = scalar_lea.hbm %s1597_s1, %s908_s26  ;;  %s1161_s13 = scalar_lea.hbm %s1597_s1, 2048 }
  0x18   : > { %s1156_s10 = scalar_lea.hbm %s1421_s30, 1024  ;;  %p1158_p12 = pneg %p1432_p9 }
  0x19   : > { %p1157_p11 = scmp.ne.s32.totalorder %s1421_s30, %s1156_s10  ;;  %p1162_p2 = scmp.lt.s32.totalorder %s1421_s30, %s1597_s1 }
  0x1a   : > { %p1163_p3 = scmp.lt.s32.totalorder %s1161_s13, %s1156_s10 }
  0x1b   : > { %p1159_p13 = pnand %p1158_p12, %p1157_p11 }
  0x1c   : > { %p1164_p5 = por %p1163_p3, %p1162_p2 }
  0x1d   : > { %p1160_p0 = pneg %p1159_p13 }
  0x1f   : > { %p1165_p8 = pnand %p1164_p5, %p1160_p0 }
  0x21   : > { %1168 = shalt.err (!%p1165_p8)
}
  0x22   : > { %s1169_s26 = scalar_lea.vmem %s1425_s6, 1024  ;;  %p1177_p13 = scmp.lt.s32.totalorder %s1425_s6, %s1425_s6 }
  0x23   : > { %p1170_p10 = scmp.ne.s32.totalorder %s1425_s6, %s1169_s26  ;;  %p1178_p4 = scmp.lt.s32.totalorder %s1169_s26, %s1169_s26 }
  0x25   : > { %p1172_p6 = pnand %p1170_p10, %p1158_p12  ;;  %p1179_p7 = por %p1178_p4, %p1177_p13 }
  0x27   : > { %p1173_p11 = pneg %p1172_p6 }
  0x29   : > { %p1180_p1 = pnand %p1179_p7, %p1173_p11 }
  0x2b   : > { %1183 = shalt.err (!%p1180_p1)
}
  0x2c   : > { %s1330_s28 = smov 64   ;;  %s1331_s29 = smov 4  }
  0x2d   : > { %1062 = dma.hbm_to_vmem [thread:$0]  (!%p1432_p9), %s1421_s30, 1024, %s1425_s6, [#allocation8], %s1330_s28, %s1330_s28, %s1331_s29  }
  0x2e   : > { %p1599_p8 = scmp.ne.s32.totalorder %s1593_s23, 0  ;;  %p1600_p0 = scmp.ne.s32.totalorder %s1596_s27, 0 }
  0x2f   : > { %s1195_s5 = scalar_lea.vmem %s200_s9, 1024  ;;  %p1203_p1 = scmp.lt.s32.totalorder %s200_s9, %s200_s9 }
  0x30   : > { %p1601_p10 = pneg %p1600_p0  ;;  %p1196_p2 = scmp.ne.s32.totalorder %s200_s9, %s1195_s5 }
  0x31   : > { %p1204_p3 = scmp.lt.s32.totalorder %s1195_s5, %s1195_s5 }
  0x32   : > { %p1063_p6 = pnand %p1601_p10, %p1599_p8 }
  0x33   : > { %p1205_p5 = por %p1204_p3, %p1203_p1 }
  0x34   : > { %p1186_p12 = pneg %p1063_p6 }
  0x36   : > { %p1198_p4 = pnand %p1196_p2, %p1186_p12 }
  0x38   : > { %p1199_p7 = pneg %p1198_p4 }
  0x3a   : > { %p1206_p11 = pnand %p1205_p5, %p1199_p7 }
  0x3c   : > { %1209 = shalt.err (!%p1206_p11)
}
  0x3d   : > { %1065 = dma.hbm_to_vmem [thread:$0]  (!%p1063_p6), %s1582_s2, 1024, %s200_s9, [#allocation8], %s1330_s28, %s1330_s28, %s1331_s29  }
  0x3e   : > { %s40_s30 = sadd.s32 1, %s1322_s19  ;;  %s51_s6 = sadd.s32 1, %s1314_s17 }
  0x3f   : > { %p42_p9 = scmp.ge.s32.totalorder %s40_s30, 2  ;;  %p58_p13 = scmp.ne.s32.totalorder %s1314_s17, %s1310_s16 }
  0x40   : > { %p59_p8 = scmp.eq.s32.totalorder %s1326_s20, 0  ;;  %p158_p12 = scmp.eq.s32.totalorder %s850_s21, 1 }
  0x41   : > { %s1615_s30 = smov (%p42_p9, %s40_s30), 0  ;;  %p1075_p2 = scmp.lt.s32.totalorder %s1326_s20, 2 }
  0x42   : > { %p1471_p10 = por %p59_p8, %p58_p13  ;;  %s44_s11 = ssub.s32 %s1322_s19, %s1615_s30 }
  0x43   : > { %p49_p4 = scmp.eq.s32.totalorder %s44_s11, 0  ;;  %p1480_p7 = por %p158_p12, %p58_p13 }
  0x44   : > { %s216_s12 = sand.u32 1, %s1314_s17   ;;  %s858_s13 = sshll.u32 %s1322_s19, 6 }
  0x45   : > { %s1487_s14 = scalar_select %p49_p4, %s1314_s17, %s51_s6  }
  0x46   : > { %s857_s22 = sshll.u32 %s216_s12, 2  ;;  %s227_s29 = scalar_lea.hbm %s1580_s0, %s858_s13 }
  0x47   : > { %s220_s5 = scalar_lea.vmem [#allocation4], %s857_s22  ;;  %p1494_p6 = pnand %p1075_p2, %p1471_p10 }
  0x48   : > { %s229_s8 = sshll.u32 %s220_s5, 4  ;;  %s217_s10 = scalar_lea.sflag [#allocation5], %s216_s12  ;;  %s230_s8 = int_to_ptr.vmem [resolvable:$true] %s229_s8 }
  0x49   : > { %p1212_p1 = pneg %p1494_p6  ;;  %s1223_s11 = scalar_lea.vmem %s230_s8, 64 }
  0x4a   : > { %p1224_p3 = scmp.ne.s32.totalorder %s230_s8, %s1223_s11  ;;  %s1332_s6 = smov [#allocation4]  }
  0x4b   : > { %s1228_s1 = sshll.u32 %s1332_s6, 4  ;;  %s1229_s1 = int_to_ptr.vmem [resolvable:$false] %s1228_s1 }
  0x4c   : > { %p1226_p5 = pnand %p1224_p3, %p1212_p1  ;;  %s1230_s13 = scalar_lea.vmem %s1229_s1, 128 }
  0x4d   : > { %p1231_p9 = scmp.lt.s32.totalorder %s230_s8, %s1229_s1  ;;  %p1232_p13 = scmp.lt.s32.totalorder %s1230_s13, %s1223_s11 }
  0x4e   : > { %p1227_p11 = pneg %p1226_p5 }
  0x4f   : > { %p1233_p8 = por %p1232_p13, %p1231_p9 }
  0x51   : > { %p1234_p10 = pnand %p1233_p8, %p1227_p11 }
  0x53   : > { %1237 = shalt.err (!%p1234_p10)
}
  0x54   : > { %1069 = dma.hbm_to_vmem [thread:$0]  (!%p1494_p6), %s227_s29, 64, %s230_s8, %s217_s10  }
  0x55   : > { %238 = sbr.rel (%p1600_p0) target bundleno = 600 (0x258), region = 36  ;;  %s1505_s7 = sand.u32 (!%p1600_p0), 1, %s1310_s16  }
  0x56   : > { %s860_s12 = sshll.u32 (!%p1600_p0), %s1505_s7, 2  ;;  %s241_s22 = scalar_lea.sflag (!%p1600_p0), [#allocation5], %s1505_s7 }
  0x57   : > { %s1509_s26 = scalar_lea.vmem (!%p1600_p0), [#allocation4], %s860_s12  ;;  %p1605_p12 = scmp.ne.s32.totalorder (!%p1600_p0), %s1594_s24, 0 }
  0x5a   : > { %1289 = dma.done.wait (%p1605_p12), %s241_s22, 64  }
  0x5b   : > { %1291 = vsyncadd (%p1605_p12), %s241_s22, 4294967232 }
  0x5c   : > { %1293 = dma.done.wait (%p1605_p12), [#allocation8], 1024  }
  0x5d   : > { %1295 = vsyncadd (%p1605_p12), [#allocation8], 4294966272  ;;  %p1606_p0 = scmp.ne.s32.totalorder %s1593_s23, 0 }
  0x5f   : > { %1297 = dma.done.wait (%p1606_p0), [#allocation8], 1024  }
  0x60   : > { %1299 = vsyncadd (%p1606_p0), [#allocation8], 4294966272  ;;  %v1132_v0 = vld [vmem:[#allocation9 + $0x38] sm:$0xff]   ;;  %v1133_v1 = vld [vmem:[#allocation9 + $0x30] sm:$0xff]   ;;  %v1333_v16 = vmov 0.0   ;;  %vm1334_vm0 = vmmov 0  }
  0x61   : > { %997 = vmatprep.subr.bf16.mxu0 %v1132_v0  ;;  %v1134_v2 = vld [vmem:[#allocation9 + $0x28] sm:$0xff]   ;;  %v1135_v3 = vld [vmem:[#allocation9 + $0x20] sm:$0xff]   ;;  %v1136_v5 = vld [vmem:[#allocation9 + $0x18] sm:$0xff]   ;;  %1029 = vmatprep.subr.bf16.mxu1 %v1333_v16  ;;  %s862_s1 = sshll.u32 %s1505_s7, 3  ;;  %s905_s27 = sshll.u32 %s1318_s18, 7 }
  0x62   : > { %998 = vmatpush3.bf16.msra.mxu0 %v1132_v0  ;;  %v1140_v4 = vld [vmem:[#allocation7] sm:$0xff]   ;;  %v1137_v6 = vld [vmem:[#allocation9 + $0x10] sm:$0xff]   ;;  %v1138_v7 = vld [vmem:[#allocation9 + $0x8] sm:$0xff]   ;;  %1045 = vmatprep.mubr.msk.bf16.mxu1 %vm1334_vm0, %v1333_v16  ;;  %s276_s28 = scalar_lea.vmem [#allocation10], %s862_s1  ;;  %s1532_s21 = scalar_lea.hbm %s1584_s4, %s905_s27 }
  0x63   : > { %999 = vmatprep.subr.bf16.mxu0 %v1133_v1  ;;  %1013 = vmatprep.mubr.bf16.mxu0 %v1140_v4  ;;  %v1139_v8 = vld [vmem:[#allocation9] sm:$0xff]   ;;  %v1141_v9 = vld [vmem:[#allocation7 + $0x8] sm:$0xff]   ;;  %v1142_v10 = vld [vmem:[#allocation7 + $0x10] sm:$0xff]   ;;  %s739_s29 = sshll.u32 %s276_s28, 4  ;;  %s725_s10 = scalar_lea.sflag [#allocation6], %s1505_s7  ;;  %s1534_s29 = int_to_ptr.vmem [resolvable:$true] %s739_s29 }
  0x64   : > { %v1143_v11 = vld [vmem:[#allocation7 + $0x18] sm:$0xff]   ;;  %v1144_v12 = vld [vmem:[#allocation7 + $0x20] sm:$0xff]   ;;  %v1145_v13 = vld [vmem:[#allocation7 + $0x28] sm:$0xff]   ;;  %s1238_s11 = scalar_lea.vmem %s1534_s29, 128  ;;  %s1335_s18 = smov [#allocation10]  }
  0x65   : > { %v1146_v14 = vld [vmem:[#allocation7 + $0x30] sm:$0xff]   ;;  %v1147_v15 = vld [vmem:[#allocation7 + $0x38] sm:$0xff]   ;;  %p1239_p2 = scmp.ne.s32.totalorder %s1534_s29, %s1238_s11  ;;  %s1242_s6 = sshll.u32 %s1335_s18, 4  ;;  %s1243_s6 = int_to_ptr.vmem [resolvable:$false] %s1242_s6 }
  0x66   : > { %1000 = vmatpush3.bf16.msra.mxu0 %v1133_v1  ;;  %v600_v49 = vld [vmem:[%s1509_s26] sm:$0xf]  ;;  %s1244_s13 = scalar_lea.vmem %s1243_s6, 256  ;;  %p1245_p1 = scmp.lt.s32.totalorder %s1534_s29, %s1243_s6 }
  0x67   : > { %1001 = vmatprep.subr.bf16.mxu0 %v1134_v2  ;;  %v903_v50 = vld [vmem:[%s1583_s3] ss:$0 sm:$0xff]  ;;  %p1240_p4 = pnand %p1239_p2, %p1480_p7  ;;  %p1246_p3 = scmp.lt.s32.totalorder %s1244_s13, %s1238_s11 }
  0x69   : > { %p1241_p6 = pneg %p1240_p4  ;;  %p1247_p5 = por %p1246_p3, %p1245_p1 }
  0x6a   : > { %1002 = vmatpush3.bf16.msra.mxu0 %v1134_v2 }
  0x6b   : > { %1003 = vmatprep.subr.bf16.mxu0 %v1135_v3  ;;  %p1248_p11 = pnand %p1247_p5, %p1241_p6 }
  0x6e   : > { %1004 = vmatpush3.bf16.msra.mxu0 %v1135_v3 }
  0x6f   : > { %1005 = vmatprep.subr.bf16.mxu0 %v1136_v5 }
  0x72   : > { %1006 = vmatpush3.bf16.msra.mxu0 %v1136_v5 }
  0x73   : > { %1007 = vmatprep.subr.bf16.mxu0 %v1137_v6 }
  0x76   : > { %1008 = vmatpush3.bf16.msra.mxu0 %v1137_v6 }
  0x77   : > { %1009 = vmatprep.subr.bf16.mxu0 %v1138_v7 }
  0x7a   : > { %1010 = vmatpush3.bf16.msra.mxu0 %v1138_v7 }
  0x7b   : > { %1011 = vmatprep.subr.bf16.mxu0 %v1139_v8 }
  0x7e   : > { %1012 = vmatpush3.bf16.msra.mxu0 %v1139_v8 }
  0x81   : > { %1014 = vmatmul.mubr.bf16.vlgmr.msra.gmra.mxu0 %v1141_v9 }
  0x82   : > { %1017 = vmatprep.mubr.bf16.mxu0 %v1142_v10 }
  0x89   : > { %1018 = vmatmul.mubr.bf16.gmra.mxu0 %v1143_v11 }
  0x8a   : > { %1021 = vmatprep.mubr.bf16.mxu0 %v1144_v12 }
  0x91   : > { %1022 = vmatmul.mubr.bf16.gmra.mxu0 %v1145_v13 }
  0x92   : > { %1025 = vmatprep.mubr.bf16.mxu0 %v1146_v14 }
  0x99   : > { %1026 = vmatmul.mubr.bf16.gmra.mxu0 %v1147_v15 }
 0x141   : > { %v1015_v17 = vpop.f32.mrf.mxu0 }
 0x143   : > { %v449_v18 = vpop.f32.mrf.mxu0 }
 0x145   : > { %v1016_v19 = vpop.f32.mrf.mxu0 }
 0x146   : > { %v933_v20 = vpack.c.bf16 %v1016_v19, %v1015_v17 }
 0x147   : > { %v452_v21 = vpop.f32.mrf.mxu0 }
 0x148   : > { %965 = vst [vmem:[#allocation2 + $0x8] sm:$0xff] %v933_v20   ;;  %v928_v22 = vpack.c.bf16 %v452_v21, %v449_v18 }
 0x149   : > { %v1019_v23 = vpop.f32.mrf.mxu0 }
 0x14a   : > { %929 = vst [vmem:[#allocation2] sm:$0xff] %v928_v22  }
 0x14b   : > { %v465_v24 = vpop.f32.mrf.mxu0 }
 0x14d   : > { %v1020_v25 = vpop.f32.mrf.mxu0 }
 0x14e   : > { %v943_v26 = vpack.c.bf16 %v1020_v25, %v1019_v23 }
 0x14f   : > { %v468_v27 = vpop.f32.mrf.mxu0  ;;  %v1154_v47 = vld [vmem:[#allocation2 + $0x8] sm:$0xff]  }
 0x150   : > { %967 = vst [vmem:[#allocation2 + $0x18] sm:$0xff] %v943_v26   ;;  %v938_v28 = vpack.c.bf16 %v468_v27, %v465_v24 }
 0x151   : > { %v1023_v29 = vpop.f32.mrf.mxu0  ;;  %v1155_v48 = vld [vmem:[#allocation2] sm:$0xff]  }
 0x152   : > { %966 = vst [vmem:[#allocation2 + $0x10] sm:$0xff] %v938_v28  }
 0x153   : > { %v481_v30 = vpop.f32.mrf.mxu0 }
 0x155   : > { %v1024_v31 = vpop.f32.mrf.mxu0 }
 0x156   : > { %v953_v32 = vpack.c.bf16 %v1024_v31, %v1023_v29 }
 0x157   : > { %v484_v33 = vpop.f32.mrf.mxu0  ;;  %v1152_v45 = vld [vmem:[#allocation2 + $0x18] sm:$0xff]  }
 0x158   : > { %969 = vst [vmem:[#allocation2 + $0x28] sm:$0xff] %v953_v32   ;;  %v948_v34 = vpack.c.bf16 %v484_v33, %v481_v30 }
 0x159   : > { %v1027_v35 = vpop.f32.mrf.mxu0  ;;  %v1153_v46 = vld [vmem:[#allocation2 + $0x10] sm:$0xff]  }
 0x15a   : > { %968 = vst [vmem:[#allocation2 + $0x20] sm:$0xff] %v948_v34  }
 0x15b   : > { %v497_v36 = vpop.f32.mrf.mxu0 }
 0x15d   : > { %v1028_v37 = vpop.f32.mrf.mxu0 }
 0x15e   : > { %v963_v38 = vpack.c.bf16 %v1028_v37, %v1027_v35 }
 0x15f   : > { %v500_v39 = vpop.f32.mrf.mxu0  ;;  %v1150_v43 = vld [vmem:[#allocation2 + $0x28] sm:$0xff]  }
 0x160   : > { %971 = vst [vmem:[#allocation2 + $0x38] sm:$0xff] %v963_v38   ;;  %v958_v40 = vpack.c.bf16 %v500_v39, %v497_v36 }
 0x161   : > { %v1151_v44 = vld [vmem:[#allocation2 + $0x20] sm:$0xff]  }
 0x162   : > { %970 = vst [vmem:[#allocation2 + $0x30] sm:$0xff] %v958_v40  }
 0x167   : > { %v1148_v41 = vld [vmem:[#allocation2 + $0x38] sm:$0xff]  }
 0x168   : > { %1030 = vmatpush3.bf16.msra.mxu1 %v1148_v41 }
 0x169   : > { %1031 = vmatprep.subr.bf16.mxu1 %v1333_v16  ;;  %v1149_v42 = vld [vmem:[#allocation2 + $0x30] sm:$0xff]  }
 0x16c   : > { %1032 = vmatpush3.bf16.msra.mxu1 %v1149_v42 }
 0x16d   : > { %1033 = vmatprep.subr.bf16.mxu1 %v1333_v16 }
 0x170   : > { %1034 = vmatpush3.bf16.msra.mxu1 %v1150_v43 }
 0x171   : > { %1035 = vmatprep.subr.bf16.mxu1 %v1333_v16 }
 0x174   : > { %1036 = vmatpush3.bf16.msra.mxu1 %v1151_v44 }
 0x175   : > { %1037 = vmatprep.subr.bf16.mxu1 %v1333_v16 }
 0x178   : > { %1038 = vmatpush3.bf16.msra.mxu1 %v1152_v45 }
 0x179   : > { %1039 = vmatprep.subr.bf16.mxu1 %v1333_v16 }
 0x17c   : > { %1040 = vmatpush3.bf16.msra.mxu1 %v1153_v46 }
 0x17d   : > { %1041 = vmatprep.subr.bf16.mxu1 %v1333_v16 }
 0x180   : > { %1042 = vmatpush3.bf16.msra.mxu1 %v1154_v47 }
 0x181   : > { %1043 = vmatprep.subr.bf16.mxu1 %v1333_v16 }
 0x184   : > { %1044 = vmatpush3.bf16.msra.mxu1 %v1155_v48 }
 0x187   : > { %1046 = vmatmul.mubr.bf16.vlgmr.msra.gmra.mxu1 %v600_v49 }
 0x247   : > { %v703_v51 = vpop.f32.mrf.mxu1 }
 0x248   : > { %v722_v52 = vadd.f32 %v903_v50, %v703_v51 }
 0x249   : > { %v1047_v53 = vpop.f32.mrf.mxu1 }
 0x24a   : > { %723 = vst [vmem:[%s276_s28] sm:$0xff] %v722_v52 }
 0x24b   : > { %v706_v54 = vpop.f32.mrf.mxu1 }
 0x24c   : > { %1251 = shalt.err (!%p1248_p11)
}
 0x24d   : > { %s1252_s12 = scalar_lea.hbm %s1532_s21, 128  ;;  %s1256_s26 = scalar_lea.hbm %s1584_s4, 256 }
 0x24e   : > { %p1253_p9 = scmp.ne.s32.totalorder %s1532_s21, %s1252_s12  ;;  %p1257_p10 = scmp.lt.s32.totalorder %s1532_s21, %s1584_s4 }
 0x24f   : > { %p1258_p12 = scmp.lt.s32.totalorder %s1256_s26, %s1252_s12 }
 0x250   : > { %p1254_p13 = pnand %p1253_p9, %p1480_p7 }
 0x251   : > { %p1259_p0 = por %p1258_p12, %p1257_p10 }
 0x252   : > { %p1255_p8 = pneg %p1254_p13 }
 0x254   : > { %p1260_p2 = pnand %p1259_p0, %p1255_p8 }
 0x256   : > { %1263 = shalt.err (!%p1260_p2)
}
 0x257   : > { %1057 = dma.vmem_to_hbm [thread:$0]  (%p1480_p7), %s1534_s29, 128, %s1532_s21, %s725_s10   ;;  %v1048_v55 = vpop.f32.mrf.mxu1 }
 0x258 PF: > { %s751_s24 = sand.u32 1, %s1306_s15   ;;  %p1607_p4 = scmp.ne.s32.totalorder %s1595_s25, 0 }
 0x259   : > { %p1608_p6 = scmp.ge.s32.totalorder %s1326_s20, 2  ;;  %s752_s27 = scalar_lea.sflag [#allocation6], %s751_s24 }
 0x25b   : > { %p1071_p1 = pnand %p1608_p6, %p1607_p4 }
 0x25d   : > { %p1072_p3 = pneg %p1071_p1 }
 0x25f   : > { %1301 = dma.done.wait (%p1072_p3), %s752_s27, 128  }
 0x260   : > { %1303 = vsyncadd (%p1072_p3), %s752_s27, 4294967168  ;;  %s21_s20 = sadd.s32 1, %s1326_s20   ;;  %s1609_s15 = smov %s1310_s16 }
 0x261   : > { %p18_p5 = scmp.ge.s32.totalorder %s21_s20, 4   ;;  %s1610_s16 = smov %s1314_s17 }
 0x262   : > { %s1611_s17 = smov %s1487_s14  ;;  %s1612_s18 = smov %s1322_s19 }
 0x263   : > { %s1613_s19 = smov %s1615_s30  ;;  %20 = sbr.rel (!%p18_p5) target bundleno = 9 (0x9), region = 105 }
 0x268   :  { %757 = vsyncpa [#allocation5], 1 }
 0x269   :  { %759 = vsyncpa [#allocation5 + $0x1], 1 }
 0x26a   :  { %760 = vsyncpa [#allocation8], 1 }
 0x26b   :  { %761 = vsyncpa [#allocation6], 1 }
 0x26c   :  { %763 = vsyncpa [#allocation6 + $0x1], 1 }

// kernel: tpu_custom_call.1
= control target key start
LH: loop header
LB: loop body
LE: loop exit
PB: predicated region body
PF: predicated region fallthrough
CT: control target
= control target key end

     0   :  { %s1607_s0 = inlined_call_operand.hbm [shape: bf16[2,8,128], index: 0, kind: input, shape index: {}]   ;;  %s1608_s1 = inlined_call_operand.hbm [shape: bf16[2,128,128], index: 1, kind: input, shape index: {}]   ;;  %s1609_s2 = inlined_call_operand.hbm [shape: bf16[128,128], index: 2, kind: input, shape index: {}]   ;;  %s1610_s3 = inlined_call_operand.vmem [shape: f32[1,128], index: 3, kind: input, shape index: {}]   ;;  %s1611_s4 = inlined_call_operand.hbm [shape: f32[2,8,128], index: 4, kind: output, shape index: {}]  }
   0x1   :  { %1616 = sst [smem:[#allocation17_spill]] %s1607_s0 }
   0x2   :  { %1617 = sst [smem:[#allocation18_spill]] %s1609_s2 }
   0x3   :  { %9 = vsyncpa [#allocation5], 0 }
   0x4   :  { %11 = vsyncpa [#allocation5 + $0x1], 0 }
   0x5   :  { %12 = vsyncpa [#allocation8], 0 }
   0x6   :  { %14 = vsyncpa [#allocation8 + $0x1], 0 }
   0x7   :  { %15 = vsyncpa [#allocation6], 0 }
   0x8   :  { %17 = vsyncpa [#allocation6 + $0x1], 0  ;;  %s1390_s15 = smov 0   ;;  %s1392_s16 = smov 0  }
   0x9   :  { %s1394_s17 = smov 0   ;;  %s1396_s18 = smov 0  }
   0xa   :  { %s1398_s19 = smov 0   ;;  %s1400_s20 = smov 0  }
   0xb LB: > { %1618 = sst [smem:[#allocation15_spill]] %s1351_s19  ;;  %s1421_s21 = sadd.s32 4294967295, %s1355_s20   ;;  %s1355_s20 = sphi %s1400_s20, %s23_s20   ;;  %s1351_s19 = sphi %s1398_s19, %s1634_s19   ;;  %s1347_s18 = sphi %s1396_s18, %s1633_s18   ;;  %s1343_s17 = sphi %s1394_s17, %s1637_s17   ;;  %s1339_s16 = sphi %s1392_s16, %s1636_s16   ;;  %s1335_s15 = sphi %s1390_s15, %s1635_s15  }
   0xc   : > { %s879_s22 = sadd.s32 4294967294, %s1355_s20   ;;  %p66_p0 = scmp.ne.s32.totalorder %s1339_s16, %s1335_s15 }
   0xd   : > { %p67_p1 = scmp.eq.s32.totalorder %s1421_s21, 0  ;;  %p166_p3 = scmp.eq.s32.totalorder %s879_s22, 1 }
   0xe   : > { %p880_p5 = scmp.ge.s32.totalorder %s1355_s20, 1  ;;  %p173_p7 = scmp.lt.s32.totalorder %s1355_s20, 3 }
   0xf   : > { %p1430_p4 = por %p67_p1, %p66_p0  ;;  %p1435_p6 = por %p166_p3, %p66_p0 }
  0x10   : > { %p1440_p8 = pnand %p880_p5, %p173_p7  ;;  %s1357_s26 = smov [#allocation9]  }
  0x11   : > { %s1620_s24 = scalar_select %p1435_p6, 1, 0 }
  0x12   : > { %s185_s27 = sshll.u32 %s1357_s26, 4  ;;  %p1089_p9 = pneg %p1440_p8  ;;  %s186_s27 = int_to_ptr.vmem [resolvable:$true] %s185_s27 }
  0x13   : > { %p882_p10 = scmp.ge.s32.totalorder %s1355_s20, 2  ;;  %s42_s29 = sadd.s32 1, %s1351_s19 }
  0x14   : > { %p1449_p11 = pnand %p1089_p9, %p67_p1  ;;  %s1196_s30 = scalar_lea.vmem %s186_s27, 1024 }
  0x15   : > { %p1197_p13 = scmp.ne.s32.totalorder %s186_s27, %s1196_s30  ;;  %p1204_p5 = scmp.lt.s32.totalorder %s186_s27, %s186_s27 }
  0x16   : > { %p1187_p12 = pneg %p1449_p11  ;;  %p1205_p7 = scmp.lt.s32.totalorder %s1196_s30, %s1196_s30 }
  0x18   : > { %p1199_p0 = pnand %p1197_p13, %p1187_p12  ;;  %p1206_p2 = por %p1205_p7, %p1204_p5 }
  0x1a   : > { %p1200_p3 = pneg %p1199_p0 }
  0x1c   : > { %p1207_p6 = pnand %p1206_p2, %p1200_p3 }
  0x1e   : > { %1210 = shalt.err (!%p1207_p6)
}
  0x1f   : > { %s1612_s5 = smov 64   ;;  %s1613_s6 = smov 4  }
  0x20   : > { %s1623_s2 = sld [smem:[#allocation18_spill]]  ;;  %p44_p2 = scmp.ge.s32.totalorder %s42_s29, 2 }
  0x21   : > { %s53_s9 = sadd.s32 1, %s1343_s17  ;;  %p60_p6 = scmp.ne.s32.totalorder %s1343_s17, %s1339_s16 }
  0x22   : > { %p61_p9 = scmp.eq.s32.totalorder %s1355_s20, 0  ;;  %s1639_s29 = smov (%p44_p2, %s42_s29), 0 }
  0x23   : > { %1624 = sst [smem:[#allocation16_spill]] %s1639_s29  ;;  %p1626_p13 = scmp.eq.s32.totalorder %s1421_s21, 1 }
  0x24   : > { %p1470_p12 = por %p61_p9, %p60_p6  ;;  %s46_s12 = ssub.s32 %s1351_s19, %s1639_s29 }
  0x25   : > { %p1476_p0 = por %p1626_p13, %p60_p6  ;;  %p51_p3 = scmp.eq.s32.totalorder %s46_s12, 0 }
  0x26   : > { %1092 = dma.hbm_to_vmem [thread:$0]  (!%p1449_p11), %s1623_s2, 1024, %s186_s27, [#allocation8], %s1612_s5, %s1612_s5, %s1613_s6  }
  0x27   : > { %p1105_p11 = scmp.lt.s32.totalorder %s1355_s20, 2  ;;  %s202_s13 = sand.u32 1, %s1343_s17  }
  0x28   : > { %s883_s14 = sshll.u32 %s202_s13, 2  ;;  %s884_s26 = sshll.u32 %s1351_s19, 6 }
  0x29   : > { %s1485_s22 = scalar_select %p51_p3, %s1343_s17, %s53_s9  }
  0x2a   : > { %s1628_s0 = sld [smem:[#allocation17_spill]]  ;;  %s206_s7 = scalar_lea.vmem [#allocation4], %s883_s14 }
  0x2b   : > { %s215_s8 = sshll.u32 %s206_s7, 4  ;;  %p1493_p5 = pnand %p1105_p11, %p1470_p12  ;;  %s216_s8 = int_to_ptr.vmem [resolvable:$true] %s215_s8 }
  0x2c   : > { %s885_s12 = sshll.u32 %s202_s13, 6  ;;  %s938_s6 = sshll.u32 %s1351_s19, 10 }
  0x2d   : > { %s203_s2 = scalar_lea.sflag [#allocation5], %s202_s13  ;;  %p1213_p7 = pneg %p1493_p5 }
  0x2e   : > { %s1224_s9 = scalar_lea.vmem %s216_s8, 64  ;;  %s1360_s14 = smov [#allocation4]  }
  0x2f   : > { %p1225_p2 = scmp.ne.s32.totalorder %s216_s8, %s1224_s9 }
  0x30   : > { %s213_s30 = scalar_lea.hbm %s1628_s0, %s884_s26  ;;  %s1229_s26 = sshll.u32 %s1360_s14, 4  ;;  %s1230_s26 = int_to_ptr.vmem [resolvable:$false] %s1229_s26 }
  0x31   : > { %p1227_p6 = pnand %p1225_p2, %p1213_p7  ;;  %s1231_s10 = scalar_lea.vmem %s1230_s26, 128 }
  0x32   : > { %p1232_p12 = scmp.lt.s32.totalorder %s216_s8, %s1230_s26  ;;  %p1233_p13 = scmp.lt.s32.totalorder %s1231_s10, %s1224_s9 }
  0x33   : > { %p1228_p9 = pneg %p1227_p6 }
  0x34   : > { %p1234_p11 = por %p1233_p13, %p1232_p12 }
  0x36   : > { %p1235_p3 = pnand %p1234_p11, %p1228_p9 }
  0x38   : > { %1238 = shalt.err (!%p1235_p3)
}
  0x39   : > { %1096 = dma.hbm_to_vmem [thread:$0]  (!%p1493_p5), %s213_s30, 64, %s216_s8, %s203_s2  }
  0x3a   : > { %s226_s13 = scalar_lea.vmem [#allocation7], %s885_s12  ;;  %s222_s28 = sand.u32 1, %s1355_s20  }
  0x3b   : > { %s233_s27 = sshll.u32 %s226_s13, 4  ;;  %s232_s14 = scalar_lea.hbm %s1608_s1, %s938_s6  ;;  %s234_s27 = int_to_ptr.vmem [resolvable:$true] %s233_s27 }
  0x3c   : > { %s223_s29 = scalar_lea.sflag [#allocation8], %s222_s28  ;;  %s1252_s19 = scalar_lea.vmem %s234_s27, 1024 }
  0x3d   : > { %p1253_p2 = scmp.ne.s32.totalorder %s234_s27, %s1252_s19  ;;  %s1361_s9 = smov [#allocation7]  }
  0x3e   : > { %s1257_s26 = sshll.u32 %s1361_s9, 4  ;;  %s1258_s26 = int_to_ptr.vmem [resolvable:$false] %s1257_s26 }
  0x3f   : > { %p1255_p6 = pnand %p1253_p2, %p1213_p7  ;;  %s1259_s10 = scalar_lea.vmem %s1258_s26, 2048 }
  0x40   : > { %p1260_p12 = scmp.lt.s32.totalorder %s234_s27, %s1258_s26  ;;  %p1261_p13 = scmp.lt.s32.totalorder %s1259_s10, %s1252_s19 }
  0x41   : > { %p1256_p9 = pneg %p1255_p6 }
  0x42   : > { %p1262_p11 = por %p1261_p13, %p1260_p12 }
  0x44   : > { %p1263_p3 = pnand %p1262_p11, %p1256_p9 }
  0x46   : > { %1266 = shalt.err (!%p1263_p3)
}
  0x47   : > { %s1630_s0 = smov 4   ;;  %s1631_s2 = smov 64  }
  0x48   : > { %1099 = dma.hbm_to_vmem [thread:$0]  (!%p1493_p5), %s232_s14, 1024, %s234_s27, %s223_s29, %s1631_s2, %s1631_s2, %s1630_s0  }
  0x49   : > { %245 = sbr.rel (%p1440_p8) target bundleno = 588 (0x24c), region = 36  ;;  %s1520_s6 = sand.u32 (!%p1440_p8), 1, %s1339_s16  }
  0x4a   : > { %s889_s30 = sshll.u32 (!%p1440_p8), %s1520_s6, 2  ;;  %s248_s19 = scalar_lea.sflag (!%p1440_p8), [#allocation5], %s1520_s6 }
  0x4b   : > { %s1524_s8 = scalar_lea.vmem (!%p1440_p8), [#allocation4], %s889_s30 }
  0x4e   : > { %1318 = dma.done.wait (%p1430_p4), %s248_s19, 64  }
  0x4f   : > { %1320 = vsyncadd (%p1430_p4), %s248_s19, 4294967232  ;;  %s256_s25 = sand.u32 1, %s1421_s21   ;;  %s890_s29 = sshll.u32 %s1520_s6, 6 }
  0x50   : > { %s257_s5 = scalar_lea.sflag [#allocation8], %s256_s25  ;;  %s1532_s12 = scalar_lea.vmem [#allocation7], %s890_s29 }
  0x51   : > { %1322 = dma.done.wait (%p1430_p4), %s257_s5, 1024  }
  0x52   : > { %1324 = vsyncadd (%p1430_p4), %s257_s5, 4294966272 }
  0x53   : > { %1326 = dma.done.wait (%p67_p1), [#allocation8], 1024  }
  0x54   : > { %1328 = vsyncadd (%p67_p1), [#allocation8], 4294966272  ;;  %v1161_v0 = vld [vmem:[#allocation9 + $0x38] sm:$0xff]   ;;  %v1162_v1 = vld [vmem:[#allocation9 + $0x30] sm:$0xff]   ;;  %v1362_v16 = vmov 0.0   ;;  %vm1363_vm0 = vmmov 0  }
  0x55   : > { %1027 = vmatprep.subr.bf16.mxu0 %v1161_v0  ;;  %v1163_v2 = vld [vmem:[#allocation9 + $0x28] sm:$0xff]   ;;  %v1164_v3 = vld [vmem:[#allocation9 + $0x20] sm:$0xff]   ;;  %v1165_v5 = vld [vmem:[#allocation9 + $0x18] sm:$0xff]   ;;  %1059 = vmatprep.subr.bf16.mxu1 %v1362_v16  ;;  %s892_s21 = sshll.u32 %s1520_s6, 3  ;;  %s935_s27 = sshll.u32 %s1347_s18, 7 }
  0x56   : > { %1028 = vmatpush3.bf16.msra.mxu0 %v1161_v0  ;;  %v1169_v4 = vld [vmem:[%s1532_s12] sm:$0xff]   ;;  %v1166_v6 = vld [vmem:[#allocation9 + $0x10] sm:$0xff]   ;;  %v1167_v7 = vld [vmem:[#allocation9 + $0x8] sm:$0xff]   ;;  %1075 = vmatprep.mubr.msk.bf16.mxu1 %vm1363_vm0, %v1362_v16  ;;  %s293_s28 = scalar_lea.vmem [#allocation10], %s892_s21  ;;  %s1559_s26 = scalar_lea.hbm %s1611_s4, %s935_s27 }
  0x57   : > { %1029 = vmatprep.subr.bf16.mxu0 %v1162_v1  ;;  %1043 = vmatprep.mubr.bf16.mxu0 %v1169_v4  ;;  %v1168_v8 = vld [vmem:[#allocation9] sm:$0xff]   ;;  %v1170_v9 = vld [vmem:[%s1532_s12 + $0x8] sm:$0xff]   ;;  %v1171_v10 = vld [vmem:[%s1532_s12 + $0x10] sm:$0xff]   ;;  %s756_s7 = sshll.u32 %s293_s28, 4  ;;  %s742_s10 = scalar_lea.sflag [#allocation6], %s1520_s6  ;;  %s1561_s7 = int_to_ptr.vmem [resolvable:$true] %s756_s7 }
  0x58   : > { %v1172_v11 = vld [vmem:[%s1532_s12 + $0x18] sm:$0xff]   ;;  %v1173_v12 = vld [vmem:[%s1532_s12 + $0x20] sm:$0xff]   ;;  %v1174_v13 = vld [vmem:[%s1532_s12 + $0x28] sm:$0xff]   ;;  %s1267_s0 = scalar_lea.vmem %s1561_s7, 128  ;;  %s1364_s18 = smov [#allocation10]  }
  0x59   : > { %v1175_v14 = vld [vmem:[%s1532_s12 + $0x30] sm:$0xff]   ;;  %v1176_v15 = vld [vmem:[%s1532_s12 + $0x38] sm:$0xff]   ;;  %p1268_p1 = scmp.ne.s32.totalorder %s1561_s7, %s1267_s0  ;;  %s1271_s2 = sshll.u32 %s1364_s18, 4  ;;  %s1272_s2 = int_to_ptr.vmem [resolvable:$false] %s1271_s2 }
  0x5a   : > { %1030 = vmatpush3.bf16.msra.mxu0 %v1162_v1  ;;  %v617_v49 = vld [vmem:[%s1524_s8] sm:$0xf]  ;;  %s1273_s30 = scalar_lea.vmem %s1272_s2, 256  ;;  %p1274_p5 = scmp.lt.s32.totalorder %s1561_s7, %s1272_s2 }
  0x5b   : > { %1031 = vmatprep.subr.bf16.mxu0 %v1163_v2  ;;  %v933_v50 = vld [vmem:[%s1610_s3] ss:$0 sm:$0xff]  ;;  %p1269_p4 = pnand %p1268_p1, %p1476_p0  ;;  %p1275_p7 = scmp.lt.s32.totalorder %s1273_s30, %s1267_s0 }
  0x5d   : > { %p1270_p8 = pneg %p1269_p4  ;;  %p1276_p2 = por %p1275_p7, %p1274_p5 }
  0x5e   : > { %1032 = vmatpush3.bf16.msra.mxu0 %v1163_v2 }
  0x5f   : > { %1033 = vmatprep.subr.bf16.mxu0 %v1164_v3  ;;  %p1277_p6 = pnand %p1276_p2, %p1270_p8 }
  0x62   : > { %1034 = vmatpush3.bf16.msra.mxu0 %v1164_v3 }
  0x63   : > { %1035 = vmatprep.subr.bf16.mxu0 %v1165_v5 }
  0x66   : > { %1036 = vmatpush3.bf16.msra.mxu0 %v1165_v5 }
  0x67   : > { %1037 = vmatprep.subr.bf16.mxu0 %v1166_v6 }
  0x6a   : > { %1038 = vmatpush3.bf16.msra.mxu0 %v1166_v6 }
  0x6b   : > { %1039 = vmatprep.subr.bf16.mxu0 %v1167_v7 }
  0x6e   : > { %1040 = vmatpush3.bf16.msra.mxu0 %v1167_v7 }
  0x6f   : > { %1041 = vmatprep.subr.bf16.mxu0 %v1168_v8 }
  0x72   : > { %1042 = vmatpush3.bf16.msra.mxu0 %v1168_v8 }
  0x75   : > { %1044 = vmatmul.mubr.bf16.vlgmr.msra.gmra.mxu0 %v1170_v9 }
  0x76   : > { %1047 = vmatprep.mubr.bf16.mxu0 %v1171_v10 }
  0x7d   : > { %1048 = vmatmul.mubr.bf16.gmra.mxu0 %v1172_v11 }
  0x7e   : > { %1051 = vmatprep.mubr.bf16.mxu0 %v1173_v12 }
  0x85   : > { %1052 = vmatmul.mubr.bf16.gmra.mxu0 %v1174_v13 }
  0x86   : > { %1055 = vmatprep.mubr.bf16.mxu0 %v1175_v14 }
  0x8d   : > { %1056 = vmatmul.mubr.bf16.gmra.mxu0 %v1176_v15 }
 0x135   : > { %v1045_v17 = vpop.f32.mrf.mxu0 }
 0x137   : > { %v466_v18 = vpop.f32.mrf.mxu0 }
 0x139   : > { %v1046_v19 = vpop.f32.mrf.mxu0 }
 0x13a   : > { %v963_v20 = vpack.c.bf16 %v1046_v19, %v1045_v17 }
 0x13b   : > { %v469_v21 = vpop.f32.mrf.mxu0 }
 0x13c   : > { %995 = vst [vmem:[#allocation2 + $0x8] sm:$0xff] %v963_v20   ;;  %v958_v22 = vpack.c.bf16 %v469_v21, %v466_v18 }
 0x13d   : > { %v1049_v23 = vpop.f32.mrf.mxu0 }
 0x13e   : > { %959 = vst [vmem:[#allocation2] sm:$0xff] %v958_v22  }
 0x13f   : > { %v482_v24 = vpop.f32.mrf.mxu0 }
 0x141   : > { %v1050_v25 = vpop.f32.mrf.mxu0 }
 0x142   : > { %v973_v26 = vpack.c.bf16 %v1050_v25, %v1049_v23 }
 0x143   : > { %v485_v27 = vpop.f32.mrf.mxu0  ;;  %v1183_v47 = vld [vmem:[#allocation2 + $0x8] sm:$0xff]  }
 0x144   : > { %997 = vst [vmem:[#allocation2 + $0x18] sm:$0xff] %v973_v26   ;;  %v968_v28 = vpack.c.bf16 %v485_v27, %v482_v24 }
 0x145   : > { %v1053_v29 = vpop.f32.mrf.mxu0  ;;  %v1184_v48 = vld [vmem:[#allocation2] sm:$0xff]  }
 0x146   : > { %996 = vst [vmem:[#allocation2 + $0x10] sm:$0xff] %v968_v28  }
 0x147   : > { %v498_v30 = vpop.f32.mrf.mxu0 }
 0x149   : > { %v1054_v31 = vpop.f32.mrf.mxu0 }
 0x14a   : > { %v983_v32 = vpack.c.bf16 %v1054_v31, %v1053_v29 }
 0x14b   : > { %v501_v33 = vpop.f32.mrf.mxu0  ;;  %v1181_v45 = vld [vmem:[#allocation2 + $0x18] sm:$0xff]  }
 0x14c   : > { %999 = vst [vmem:[#allocation2 + $0x28] sm:$0xff] %v983_v32   ;;  %v978_v34 = vpack.c.bf16 %v501_v33, %v498_v30 }
 0x14d   : > { %v1057_v35 = vpop.f32.mrf.mxu0  ;;  %v1182_v46 = vld [vmem:[#allocation2 + $0x10] sm:$0xff]  }
 0x14e   : > { %998 = vst [vmem:[#allocation2 + $0x20] sm:$0xff] %v978_v34  }
 0x14f   : > { %v514_v36 = vpop.f32.mrf.mxu0 }
 0x151   : > { %v1058_v37 = vpop.f32.mrf.mxu0 }
 0x152   : > { %v993_v38 = vpack.c.bf16 %v1058_v37, %v1057_v35 }
 0x153   : > { %v517_v39 = vpop.f32.mrf.mxu0  ;;  %v1179_v43 = vld [vmem:[#allocation2 + $0x28] sm:$0xff]  }
 0x154   : > { %1001 = vst [vmem:[#allocation2 + $0x38] sm:$0xff] %v993_v38   ;;  %v988_v40 = vpack.c.bf16 %v517_v39, %v514_v36 }
 0x155   : > { %v1180_v44 = vld [vmem:[#allocation2 + $0x20] sm:$0xff]  }
 0x156   : > { %1000 = vst [vmem:[#allocation2 + $0x30] sm:$0xff] %v988_v40  }
 0x15b   : > { %v1177_v41 = vld [vmem:[#allocation2 + $0x38] sm:$0xff]  }
 0x15c   : > { %1060 = vmatpush3.bf16.msra.mxu1 %v1177_v41 }
 0x15d   : > { %1061 = vmatprep.subr.bf16.mxu1 %v1362_v16  ;;  %v1178_v42 = vld [vmem:[#allocation2 + $0x30] sm:$0xff]  }
 0x160   : > { %1062 = vmatpush3.bf16.msra.mxu1 %v1178_v42 }
 0x161   : > { %1063 = vmatprep.subr.bf16.mxu1 %v1362_v16 }
 0x164   : > { %1064 = vmatpush3.bf16.msra.mxu1 %v1179_v43 }
 0x165   : > { %1065 = vmatprep.subr.bf16.mxu1 %v1362_v16 }
 0x168   : > { %1066 = vmatpush3.bf16.msra.mxu1 %v1180_v44 }
 0x169   : > { %1067 = vmatprep.subr.bf16.mxu1 %v1362_v16 }
 0x16c   : > { %1068 = vmatpush3.bf16.msra.mxu1 %v1181_v45 }
 0x16d   : > { %1069 = vmatprep.subr.bf16.mxu1 %v1362_v16 }
 0x170   : > { %1070 = vmatpush3.bf16.msra.mxu1 %v1182_v46 }
 0x171   : > { %1071 = vmatprep.subr.bf16.mxu1 %v1362_v16 }
 0x174   : > { %1072 = vmatpush3.bf16.msra.mxu1 %v1183_v47 }
 0x175   : > { %1073 = vmatprep.subr.bf16.mxu1 %v1362_v16 }
 0x178   : > { %1074 = vmatpush3.bf16.msra.mxu1 %v1184_v48 }
 0x17b   : > { %1076 = vmatmul.mubr.bf16.vlgmr.msra.gmra.mxu1 %v617_v49 }
 0x23b   : > { %v720_v51 = vpop.f32.mrf.mxu1 }
 0x23c   : > { %v739_v52 = vadd.f32 %v933_v50, %v720_v51 }
 0x23d   : > { %v1077_v53 = vpop.f32.mrf.mxu1 }
 0x23e   : > { %740 = vst [vmem:[%s293_s28] sm:$0xff] %v739_v52 }
 0x23f   : > { %v723_v54 = vpop.f32.mrf.mxu1 }
 0x240   : > { %1280 = shalt.err (!%p1277_p6)
}
 0x241   : > { %s1281_s19 = scalar_lea.hbm %s1559_s26, 128  ;;  %s1285_s25 = scalar_lea.hbm %s1611_s4, 256 }
 0x242   : > { %p1282_p9 = scmp.ne.s32.totalorder %s1559_s26, %s1281_s19  ;;  %p1286_p11 = scmp.lt.s32.totalorder %s1559_s26, %s1611_s4 }
 0x243   : > { %p1287_p3 = scmp.lt.s32.totalorder %s1285_s25, %s1281_s19 }
 0x244   : > { %p1283_p12 = pnand %p1282_p9, %p1476_p0 }
 0x245   : > { %p1288_p1 = por %p1287_p3, %p1286_p11 }
 0x246   : > { %p1284_p13 = pneg %p1283_p12 }
 0x248   : > { %p1289_p4 = pnand %p1288_p1, %p1284_p13 }
 0x24a   : > { %1292 = shalt.err (!%p1289_p4)
}
 0x24b   : > { %1087 = dma.vmem_to_hbm [thread:$0]  (%p1476_p0), %s1561_s7, 128, %s1559_s26, %s742_s10   ;;  %v1078_v55 = vpop.f32.mrf.mxu1 }
 0x24c PF: > { %s768_s12 = sand.u32 1, %s1335_s15   ;;  %p1632_p8 = scmp.ne.s32.totalorder %s1620_s24, 0 }
 0x24d   : > { %s769_s21 = scalar_lea.sflag [#allocation6], %s768_s12 }
 0x24e   : > { %p1101_p5 = pnand %p882_p10, %p1632_p8 }
 0x250   : > { %p1102_p7 = pneg %p1101_p5 }
 0x252   : > { %1330 = dma.done.wait (%p1102_p7), %s769_s21, 128  }
 0x253   : > { %1332 = vsyncadd (%p1102_p7), %s769_s21, 4294967168  ;;  %s23_s20 = sadd.s32 1, %s1355_s20   ;;  %s1633_s18 = sld [smem:[#allocation15_spill]] }
 0x254   : > { %p20_p2 = scmp.ge.s32.totalorder %s23_s20, 4   ;;  %s1634_s19 = sld [smem:[#allocation16_spill]] }
 0x255   : > { %s1635_s15 = smov %s1339_s16  ;;  %s1636_s16 = smov %s1343_s17 }
 0x256   : > { %s1637_s17 = smov %s1485_s22  ;;  %22 = sbr.rel (!%p20_p2) target bundleno = 11 (0xb), region = 113 }
 0x25b   :  { %774 = vsyncpa [#allocation5], 1 }
 0x25c   :  { %776 = vsyncpa [#allocation5 + $0x1], 1 }
 0x25d   :  { %777 = vsyncpa [#allocation8], 1 }
 0x25e   :  { %779 = vsyncpa [#allocation8 + $0x1], 1 }
 0x25f   :  { %780 = vsyncpa [#allocation6], 1 }
 0x260   :  { %782 = vsyncpa [#allocation6 + $0x1], 1 }

</bundles_post_ra>
